<compile_context>
chip_gen: v7x
topology: tpu7x:2x2x1
jax: 0.10.0
libtpu: 0.0.40
codegen_flags: <defaults>
</compile_context>

<pallas_src>
import functools

import jax
import jax.numpy as jnp
from jax.experimental import pallas as pl
from jax.experimental.pallas import tpu as pltpu


def _round_up(x, m):
    return (x + m - 1) // m * m


def _cdiv(a, b):
    return (a + b - 1) // b


# ----------------------------- Pallas kernel -------------------------------


def _moe_expert_kernel(
    eid_ref,    # SMEM int32[(n_tiles,)]  expert id per token tile (prefetched)
    valid_ref,  # SMEM int32[(n_tiles,)]  1 iff tile holds routed tokens
    x_ref,      # (TM, D_pad)    bf16 sorted/gathered tokens
    g_ref,      # (TM, 1)        f32  per-row gate weights
    w1_ref,     # (1, D_pad, TH) bf16 W1 hidden chunk of expert eid[t]
    b1_ref,     # (1, 1, TH)     f32
    w2_ref,     # (1, TH, D_pad) bf16 W2 hidden chunk of expert eid[t]
    b2_ref,     # (1, 1, D_pad)  f32
    o_ref,      # (TM, D_pad)    f32 output block / accumulator over H chunks
    *,
    gelu_approximate,
):
    t = pl.program_id(0)
    c = pl.program_id(1)
    n_c = pl.num_programs(1)
    is_valid = valid_ref[t] != 0

    # Padding tiles (beyond the last routed group) produce exact zeros.
    @pl.when(jnp.logical_and(c == 0, jnp.logical_not(is_valid)))
    def _zero():
        o_ref[...] = jnp.zeros_like(o_ref)

    @pl.when(is_valid)
    def _compute():
        # Expert MLP chunk: GELU(x @ W1[:, chunk] + b1[chunk]) @ W2[chunk, :]
        # bf16 MXU operands, f32 accumulation.
        h = jnp.dot(x_ref[...], w1_ref[0], preferred_element_type=jnp.float32)
        h = h + b1_ref[0]
        h = jax.nn.gelu(h, approximate=gelu_approximate)
        y = jnp.dot(h.astype(jnp.bfloat16), w2_ref[0],
                    preferred_element_type=jnp.float32)

        @pl.when(c == 0)
        def _init():
            o_ref[...] = y

        @pl.when(c > 0)
        def _acc():
            o_ref[...] += y

        # Epilogue on the last hidden chunk: add b2 once, apply per-row gate.
        @pl.when(c == n_c - 1)
        def _finalize():
            o_ref[...] = g_ref[...] * (o_ref[...] + b2_ref[0])


# ------------------------- generation-aware tiling --------------------------


def _tile_params(T, D_pad, H_pad):
    """Pick (TM, TH, vmem_limit_bytes) for the current TPU generation."""
    try:
        vmem_cap = int(pltpu.get_tpu_info().vmem_capacity_bytes)
    except Exception:
        vmem_cap = 64 * 1024 * 1024  # conservative (v7x-sized) default
    vmem_limit = min(int(vmem_cap * 0.8), 110 * 1024 * 1024)

    # Token-tile: big enough to be compute-bound on weight streaming.
    # 128 MiB VMEM chips (v5e/v6e) -> 768; 64 MiB (v7x) -> 512.
    tm_target = 768 if vmem_cap >= 96 * 1024 * 1024 else 512
    act_budget = vmem_limit // 2
    tm_cap = max(16, (act_budget // (D_pad * 12)) // 16 * 16)
    tm = min(tm_target, tm_cap, _round_up(T, 16))

    # Hidden chunk: keep double-buffered (D_pad,TH)+(TH,D_pad) bf16 weight
    # blocks within ~1/3 of the scoped-VMEM budget.
    th_cap = max(128, (vmem_limit // (24 * D_pad)) // 128 * 128)
    th = min(H_pad, th_cap)
    return tm, th, vmem_limit


# --------------------------------- wrapper ----------------------------------


def moe_forward(x, params, top_k, softmax_order="softmax_topk",
                gelu_approximate=True):
    B, S, D = x.shape
    T = B * S
    xs = x.reshape(T, D).astype(jnp.float32)

    wr = params["router_w"]            # (E, D)  nn.Linear(n_embd, E, bias=False)
    E = wr.shape[0]
    w1 = params["w1"]                  # (E, D, H)
    b1 = params["b1"]                  # (E, H)
    w2 = params["w2"]                  # (E, H, D)
    b2 = params["b2"]                  # (E, D)
    H = w1.shape[-1]

    # ---- router + gating (skinny; plain XLA, f32 to match PyTorch router) ----
    router_logits = jnp.dot(xs, wr.T.astype(jnp.float32))          # (T, E) f32
    if softmax_order == "softmax_topk":
        all_probs = jax.nn.softmax(router_logits, axis=1)
        weights, selected_experts = jax.lax.top_k(all_probs, top_k)
    elif softmax_order == "topk_softmax":
        weights, selected_experts = jax.lax.top_k(router_logits, top_k)
        weights = jax.nn.softmax(weights, axis=-1)
    else:
        raise ValueError(f"Unknown softmax_order: {softmax_order}")

    # ---- tiling / padding decisions ----
    D_pad = _round_up(D, 128)          # lane-dense activations & output stores
    H_pad0 = _round_up(H, 128)
    TM, TH, vmem_limit = _tile_params(T, D_pad, H_pad0)
    H_pad = _round_up(H_pad0, TH)      # make H an exact multiple of the chunk
    n_h = H_pad // TH

    # ---- grouped (sorted-by-expert) token layout ----
    TK = T * top_k
    flat_expert = selected_experts.reshape(-1).astype(jnp.int32)    # (T*K,)
    flat_token = jnp.repeat(jnp.arange(T, dtype=jnp.int32), top_k)  # (T*K,)
    flat_gate = weights.reshape(-1).astype(jnp.float32)             # (T*K,)

    order = jnp.argsort(flat_expert)
    sorted_expert = flat_expert[order]
    sorted_token = flat_token[order]
    sorted_gate = flat_gate[order]

    counts = jnp.bincount(flat_expert, length=E)                    # (E,)
    group_start = jnp.cumsum(counts) - counts                       # exclusive
    tiles_per_e = (counts + TM - 1) // TM                           # (E,)
    tile_csum = jnp.cumsum(tiles_per_e)
    padded_start = (tile_csum - tiles_per_e) * TM                   # row offsets

    # Static upper bound on the number of tiles; trailing tiles are invalid.
    n_tiles = int(min(_cdiv(TK, TM) + E, E * _cdiv(T, TM)))
    N_pad = n_tiles * TM

    rank = jnp.arange(TK, dtype=jnp.int32) - group_start[sorted_expert].astype(jnp.int32)
    dest = (padded_start[sorted_expert].astype(jnp.int32) + rank)   # (T*K,)

    xs_bf = jnp.zeros((T, D_pad), jnp.bfloat16).at[:, :D].set(xs.astype(jnp.bfloat16))
    x_sorted = jnp.zeros((N_pad, D_pad), jnp.bfloat16).at[dest].set(xs_bf[sorted_token])
    gate_sorted = jnp.zeros((N_pad, 1), jnp.float32).at[dest].set(sorted_gate[:, None])
    # Inverse map for the scatter-add back (padding rows -> dummy row T).
    out_token = jnp.full((N_pad,), T, jnp.int32).at[dest].set(sorted_token)

    # Per-tile expert id + validity (scalar-prefetched into SMEM).
    num_active = tile_csum[-1]
    tile_idx = jnp.arange(n_tiles, dtype=jnp.int32)
    raw_eid = jnp.searchsorted(tile_csum, tile_idx, side="right").astype(jnp.int32)
    last_eid = raw_eid[jnp.maximum(num_active - 1, 0)]
    # Invalid tiles reuse the last active expert id so their weight block
    # index is unchanged and the pipeline skips the DMA entirely.
    tile_expert = jnp.where(tile_idx < num_active, raw_eid, last_eid).astype(jnp.int32)
    tile_valid = (tile_idx < num_active).astype(jnp.int32)

    # ---- padded bf16 expert weights / f32 biases ----
    w1p = jnp.zeros((E, D_pad, H_pad), jnp.bfloat16).at[:, :D, :H].set(w1.astype(jnp.bfloat16))
    b1p = jnp.zeros((E, 1, H_pad), jnp.float32).at[:, 0, :H].set(b1.astype(jnp.float32))
    w2p = jnp.zeros((E, H_pad, D_pad), jnp.bfloat16).at[:, :H, :D].set(w2.astype(jnp.bfloat16))
    b2p = jnp.zeros((E, 1, D_pad), jnp.float32).at[:, 0, :D].set(b2.astype(jnp.float32))

    grid_spec = pltpu.PrefetchScalarGridSpec(
        num_scalar_prefetch=2,
        grid=(n_tiles, n_h),
        in_specs=[
            pl.BlockSpec((TM, D_pad), lambda t, c, eid, vld: (t, 0)),       # tokens
            pl.BlockSpec((TM, 1), lambda t, c, eid, vld: (t, 0)),           # gates
            pl.BlockSpec((1, D_pad, TH), lambda t, c, eid, vld: (eid[t], 0, c)),  # W1
            pl.BlockSpec((1, 1, TH), lambda t, c, eid, vld: (eid[t], 0, c)),      # b1
            pl.BlockSpec((1, TH, D_pad), lambda t, c, eid, vld: (eid[t], c, 0)),  # W2
            pl.BlockSpec((1, 1, D_pad), lambda t, c, eid, vld: (eid[t], 0, 0)),   # b2
        ],
        out_specs=pl.BlockSpec((TM, D_pad), lambda t, c, eid, vld: (t, 0)),
    )

    out_sorted = pl.pallas_call(
        functools.partial(_moe_expert_kernel, gelu_approximate=gelu_approximate),
        out_shape=jax.ShapeDtypeStruct((N_pad, D_pad), jnp.float32),
        grid_spec=grid_spec,
        compiler_params=pltpu.CompilerParams(
            # Token tiles shard across TensorCores; since tiles are sorted by
            # expert, a contiguous split also roughly splits the expert weight
            # streaming between cores.  Hidden-chunk axis is the reduction
            # axis and comes last.
            dimension_semantics=("parallel", "arbitrary"),
            vmem_limit_bytes=vmem_limit,
        ),
    )(tile_expert, tile_valid, x_sorted, gate_sorted, w1p, b1p, w2p, b2p)

    # ---- un-sort: scatter-add per-(token, expert) outputs back to tokens ----
    combined = jnp.zeros((T + 1, D_pad), jnp.float32).at[out_token].add(out_sorted)
    out = combined[:T, :D].reshape(B, S, D).astype(x.dtype)

    return out, {"router_logits": router_logits,
                 "selected_experts": selected_experts}


# ------------------------ pure-JAX reference (check) ------------------------


def moe_reference(x, params, top_k, softmax_order="softmax_topk",
                  gelu_approximate=True, matmul_dtype=jnp.bfloat16):
    """Reference using the same bf16-matmul / f32-accumulate policy as the kernel."""
    B, S, D = x.shape
    xs = x.reshape(-1, D).astype(jnp.float32)
    wr = params["router_w"]
    logits = jnp.dot(xs, wr.T.astype(jnp.float32))
    if softmax_order == "softmax_topk":
        probs = jax.nn.softmax(logits, axis=1)
        weights, selected = jax.lax.top_k(probs, top_k)
    elif softmax_order == "topk_softmax":
        weights, selected = jax.lax.top_k(logits, top_k)
        weights = jax.nn.softmax(weights, axis=-1)
    else:
        raise ValueError(f"Unknown softmax_order: {softmax_order}")
    E = wr.shape[0]
    gates = jnp.sum(
        jnp.where(selected[..., None] == jnp.arange(E), weights[..., None], 0.0),
        axis=1,
    )
    xs_m = xs.astype(matmul_dtype)
    out = jnp.zeros_like(xs)
    for e in range(E):
        h = jnp.dot(xs_m, params["w1"][e].astype(matmul_dtype),
                    preferred_element_type=jnp.float32) + params["b1"][e]
        h = jax.nn.gelu(h, approximate=gelu_approximate)
        y = jnp.dot(h.astype(matmul_dtype), params["w2"][e].astype(matmul_dtype),
                    preferred_element_type=jnp.float32) + params["b2"][e]
        out = out + gates[:, e:e + 1] * y
    return out.reshape(B, S, D)


# ----------------------------------- main -----------------------------------

if __name__ == "__main__":
    # config: n_embd=32, moe_num_experts=4, moe_num_experts_per_tok=2,
    # softmax_order='softmax_topk'; expert MLP hidden = 4 * n_embd = 128.
    B, S, D = 2, 8, 32
    E, K, H = 4, 2, 4 * 32

    key = jax.random.PRNGKey(0)
    kx, kr, k1, kb1, k2, kb2 = jax.random.split(key, 6)

    x = jax.random.normal(kx, (B, S, D), dtype=jnp.float32)
    params = {
        "router_w": 0.1 * jax.random.normal(kr, (E, D), dtype=jnp.float32),
        "w1": 0.05 * jax.random.normal(k1, (E, D, H), dtype=jnp.float32),
        "b1": 0.01 * jax.random.normal(kb1, (E, H), dtype=jnp.float32),
        "w2": 0.05 * jax.random.normal(k2, (E, H, D), dtype=jnp.float32),
        "b2": 0.01 * jax.random.normal(kb2, (E, D), dtype=jnp.float32),
    }

    fwd = jax.jit(functools.partial(moe_forward, top_k=K,
                                    softmax_order="softmax_topk",
                                    gelu_approximate=True))
    out, aux = fwd(x, params)
    out = jax.block_until_ready(out)

    ref = moe_reference(x, params, top_k=K, softmax_order="softmax_topk",
                        gelu_approximate=True, matmul_dtype=jnp.bfloat16)

    assert out.shape == x.shape
    assert aux["router_logits"].shape == (B * S, E)
    assert aux["selected_experts"].shape == (B * S, K)
    assert jnp.allclose(out, ref, atol=1e-4, rtol=1e-3), "mismatch vs reference"

    print("KERNEL_OK")
</pallas_src>

<mosaic_0001>
module attributes {stable_mosaic.version = 11 : i64} {
  func.func private @main(%arg0: i32) attributes {dimension_semantics = [#tpu.dimension_semantics<core_parallel>], iteration_bounds = array<i64: 2>, tpu.core_type = #tpu.core_type<sc_scalar_subcore>, window_params = []} {
    return
  }
}

module attributes {stable_mosaic.version = 11 : i64} {
  func.func private @main(%arg0: i32) attributes {dimension_semantics = [#tpu.dimension_semantics<core_parallel>], iteration_bounds = array<i64: 2>, tpu.core_type = #tpu.core_type<sc_scalar_subcore>, window_params = []} {
    return
  }
}

module attributes {stable_mosaic.version = 11 : i64} {
  func.func @_moe_expert_kernel(%arg0: i32, %arg1: i32, %arg2: memref<4xi32, #tpu.memory_space<smem>>, %arg3: memref<4xi32, #tpu.memory_space<smem>>, %arg4: memref<16x128xbf16, #tpu.memory_space<vmem>>, %arg5: memref<16x1xf32, #tpu.memory_space<vmem>>, %arg6: memref<1x128x128xbf16, #tpu.memory_space<vmem>>, %arg7: memref<1x1x128xf32, #tpu.memory_space<vmem>>, %arg8: memref<1x128x128xbf16, #tpu.memory_space<vmem>>, %arg9: memref<1x1x128xf32, #tpu.memory_space<vmem>>, %arg10: memref<16x128xf32, #tpu.memory_space<vmem>>) attributes {dimension_semantics = [#tpu.dimension_semantics<parallel>, #tpu.dimension_semantics<arbitrary>], iteration_bounds = array<i64: 4, 1>, scalar_prefetch = 2 : i64, scratch_operands = 0 : i64, tpu.core_type = #tpu.core_type<tc>, window_params = [{transform_indices = @transform_0, window_bounds = array<i64: 16, 128>}, {transform_indices = @transform_1, window_bounds = array<i64: 16, 1>}, {transform_indices = @transform_2, window_bounds = array<i64: 1, 128, 128>}, {transform_indices = @transform_3, window_bounds = array<i64: 1, 1, 128>}, {transform_indices = @transform_4, window_bounds = array<i64: 1, 128, 128>}, {transform_indices = @transform_5, window_bounds = array<i64: 1, 1, 128>}, {transform_indices = @transform_6, window_bounds = array<i64: 16, 128>}]} {
    %0 = arith.index_cast %arg0 : i32 to index
    %1 = memref.load %arg3[%0] : memref<4xi32, #tpu.memory_space<smem>>
    %c0_i32 = arith.constant 0 : i32
    %2 = arith.cmpi ne, %1, %c0_i32 : i32
    %c0_i32_0 = arith.constant 0 : i32
    %3 = arith.cmpi eq, %arg1, %c0_i32_0 : i32
    %true = arith.constant true
    %4 = arith.xori %2, %true : i1
    %5 = arith.andi %3, %4 : i1
    %6 = arith.extui %5 : i1 to i32
    %c0_i32_1 = arith.constant 0 : i32
    %7 = arith.cmpi ne, %6, %c0_i32_1 : i32
    scf.if %7 {
      %cst = arith.constant 0.000000e+00 : f32
      %10 = vector.broadcast %cst : f32 to vector<16x128xf32>
      %c0 = arith.constant 0 : index
      %c0_3 = arith.constant 0 : index
      %11 = vector.load %arg10[%c0, %c0_3] : memref<16x128xf32, #tpu.memory_space<vmem>>, vector<16x128xf32>
      tpu.vector_store %arg10[%c0, %c0_3], %10 {strides = array<i32>} : memref<16x128xf32, #tpu.memory_space<vmem>>, vector<16x128xf32>,
    } else {
    }
    %8 = arith.extui %2 : i1 to i32
    %c0_i32_2 = arith.constant 0 : i32
    %9 = arith.cmpi ne, %8, %c0_i32_2 : i32
    scf.if %9 {
      %c0 = arith.constant 0 : index
      %c0_3 = arith.constant 0 : index
      %10 = vector.load %arg4[%c0, %c0_3] : memref<16x128xbf16, #tpu.memory_space<vmem>>, vector<16x128xbf16>
      %c0_4 = arith.constant 0 : index
      %c0_5 = arith.constant 0 : index
      %c0_6 = arith.constant 0 : index
      %11 = vector.load %arg6[%c0_4, %c0_5, %c0_6] : memref<1x128x128xbf16, #tpu.memory_space<vmem>>, vector<1x128x128xbf16>
      %12 = vector.shape_cast %11 : vector<1x128x128xbf16> to vector<128x128xbf16>
      %cst = arith.constant dense<0.000000e+00> : vector<16x128xf32>
      %13 = tpu.matmul %10, %12, %cst {dimension_numbers = #tpu.dot_dimension_numbers<[1], [0], [0], [1], [0, 0, 1, 1], [], []>} : vector<16x128xbf16>, vector<128x128xbf16>, vector<16x128xf32> -> vector<16x128xf32>
      %c0_7 = arith.constant 0 : index
      %c0_8 = arith.constant 0 : index
      %c0_9 = arith.constant 0 : index
      %14 = vector.load %arg7[%c0_7, %c0_8, %c0_9] : memref<1x1x128xf32, #tpu.memory_space<vmem>>, vector<1x1x128xf32>
      %15 = vector.shape_cast %14 : vector<1x1x128xf32> to vector<1x128xf32>
      %16 = vector.broadcast %15 : vector<1x128xf32> to vector<16x128xf32>
      %17 = arith.addf %13, %16 : vector<16x128xf32>
      %18 = arith.mulf %17, %17 : vector<16x128xf32>
      %19 = arith.mulf %17, %18 : vector<16x128xf32>
      %cst_10 = arith.constant 4.471500e-02 : f32
      %20 = vector.broadcast %cst_10 : f32 to vector<16x128xf32>
      %21 = arith.mulf %20, %19 : vector<16x128xf32>
      %22 = arith.addf %17, %21 : vector<16x128xf32>
      %cst_11 = arith.constant 0.797884583 : f32
      %23 = vector.broadcast %cst_11 : f32 to vector<16x128xf32>
      %24 = arith.mulf %23, %22 : vector<16x128xf32>
      %25 = math.tanh %24 : vector<16x128xf32>
      %cst_12 = arith.constant 1.000000e+00 : f32
      %26 = vector.broadcast %cst_12 : f32 to vector<16x128xf32>
      %27 = arith.addf %26, %25 : vector<16x128xf32>
      %cst_13 = arith.constant 5.000000e-01 : f32
      %28 = vector.broadcast %cst_13 : f32 to vector<16x128xf32>
      %29 = arith.mulf %28, %27 : vector<16x128xf32>
      %30 = arith.mulf %17, %29 : vector<16x128xf32>
      %31 = arith.truncf %30 : vector<16x128xf32> to vector<16x128xbf16>
      %c0_14 = arith.constant 0 : index
      %c0_15 = arith.constant 0 : index
      %c0_16 = arith.constant 0 : index
      %32 = vector.load %arg8[%c0_14, %c0_15, %c0_16] : memref<1x128x128xbf16, #tpu.memory_space<vmem>>, vector<1x128x128xbf16>
      %33 = vector.shape_cast %32 : vector<1x128x128xbf16> to vector<128x128xbf16>
      %cst_17 = arith.constant dense<0.000000e+00> : vector<16x128xf32>
      %34 = tpu.matmul %31, %33, %cst_17 {dimension_numbers = #tpu.dot_dimension_numbers<[1], [0], [0], [1], [0, 0, 1, 1], [], []>} : vector<16x128xbf16>, vector<128x128xbf16>, vector<16x128xf32> -> vector<16x128xf32>
      %c0_i32_18 = arith.constant 0 : i32
      %35 = arith.cmpi eq, %arg1, %c0_i32_18 : i32
      %36 = arith.extui %35 : i1 to i32
      %c0_i32_19 = arith.constant 0 : i32
      %37 = arith.cmpi ne, %36, %c0_i32_19 : i32
      scf.if %37 {
        %c0_24 = arith.constant 0 : index
        %c0_25 = arith.constant 0 : index
        %44 = vector.load %arg10[%c0_24, %c0_25] : memref<16x128xf32, #tpu.memory_space<vmem>>, vector<16x128xf32>
        tpu.vector_store %arg10[%c0_24, %c0_25], %34 {strides = array<i32>} : memref<16x128xf32, #tpu.memory_space<vmem>>, vector<16x128xf32>,
      } else {
      }
      %c0_i32_20 = arith.constant 0 : i32
      %38 = arith.cmpi sgt, %arg1, %c0_i32_20 : i32
      %39 = arith.extui %38 : i1 to i32
      %c0_i32_21 = arith.constant 0 : i32
      %40 = arith.cmpi ne, %39, %c0_i32_21 : i32
      scf.if %40 {
        %c0_24 = arith.constant 0 : index
        %c0_25 = arith.constant 0 : index
        %44 = vector.load %arg10[%c0_24, %c0_25] : memref<16x128xf32, #tpu.memory_space<vmem>>, vector<16x128xf32>
        %45 = arith.addf %44, %34 : vector<16x128xf32>
        %c0_26 = arith.constant 0 : index
        %c0_27 = arith.constant 0 : index
        %46 = vector.load %arg10[%c0_26, %c0_27] : memref<16x128xf32, #tpu.memory_space<vmem>>, vector<16x128xf32>
        tpu.vector_store %arg10[%c0_26, %c0_27], %45 {strides = array<i32>} : memref<16x128xf32, #tpu.memory_space<vmem>>, vector<16x128xf32>,
      } else {
      }
      %c0_i32_22 = arith.constant 0 : i32
      %41 = arith.cmpi eq, %arg1, %c0_i32_22 : i32
      %42 = arith.extui %41 : i1 to i32
      %c0_i32_23 = arith.constant 0 : i32
      %43 = arith.cmpi ne, %42, %c0_i32_23 : i32
      scf.if %43 {
        %c0_24 = arith.constant 0 : index
        %c0_25 = arith.constant 0 : index
        %44 = vector.load %arg5[%c0_24, %c0_25] : memref<16x1xf32, #tpu.memory_space<vmem>>, vector<16x1xf32>
        %c0_26 = arith.constant 0 : index
        %c0_27 = arith.constant 0 : index
        %45 = vector.load %arg10[%c0_26, %c0_27] : memref<16x128xf32, #tpu.memory_space<vmem>>, vector<16x128xf32>
        %c0_28 = arith.constant 0 : index
        %c0_29 = arith.constant 0 : index
        %c0_30 = arith.constant 0 : index
        %46 = vector.load %arg9[%c0_28, %c0_29, %c0_30] : memref<1x1x128xf32, #tpu.memory_space<vmem>>, vector<1x1x128xf32>
        %47 = vector.shape_cast %46 : vector<1x1x128xf32> to vector<1x128xf32>
        %48 = vector.broadcast %47 : vector<1x128xf32> to vector<16x128xf32>
        %49 = arith.addf %45, %48 : vector<16x128xf32>
        %50 = vector.broadcast %44 : vector<16x1xf32> to vector<16x128xf32>
        %51 = arith.mulf %50, %49 : vector<16x128xf32>
        %c0_31 = arith.constant 0 : index
        %c0_32 = arith.constant 0 : index
        %52 = vector.load %arg10[%c0_31, %c0_32] : memref<16x128xf32, #tpu.memory_space<vmem>>, vector<16x128xf32>
        tpu.vector_store %arg10[%c0_31, %c0_32], %51 {strides = array<i32>} : memref<16x128xf32, #tpu.memory_space<vmem>>, vector<16x128xf32>,
      } else {
      }
    } else {
    }
    return
  }
  func.func @transform_0(%arg0: i32, %arg1: i32, %arg2: memref<4xi32, #tpu.memory_space<smem>>, %arg3: memref<4xi32, #tpu.memory_space<smem>>) -> (i32, i32) {
    %c0_i32 = arith.constant 0 : i32
    %c0_i32_0 = arith.constant 0 : i32
    return %arg0, %c0_i32 : i32, i32
  }
  func.func @transform_1(%arg0: i32, %arg1: i32, %arg2: memref<4xi32, #tpu.memory_space<smem>>, %arg3: memref<4xi32, #tpu.memory_space<smem>>) -> (i32, i32) {
    %c0_i32 = arith.constant 0 : i32
    %c0_i32_0 = arith.constant 0 : i32
    return %arg0, %c0_i32 : i32, i32
  }
  func.func @transform_2(%arg0: i32, %arg1: i32, %arg2: memref<4xi32, #tpu.memory_space<smem>>, %arg3: memref<4xi32, #tpu.memory_space<smem>>) -> (i32, i32, i32) {
    %0 = arith.index_cast %arg0 : i32 to index
    %1 = memref.load %arg2[%0] : memref<4xi32, #tpu.memory_space<smem>>
    %c0_i32 = arith.constant 0 : i32
    %c0_i32_0 = arith.constant 0 : i32
    return %1, %c0_i32, %arg1 : i32, i32, i32
  }
  func.func @transform_3(%arg0: i32, %arg1: i32, %arg2: memref<4xi32, #tpu.memory_space<smem>>, %arg3: memref<4xi32, #tpu.memory_space<smem>>) -> (i32, i32, i32) {
    %0 = arith.index_cast %arg0 : i32 to index
    %1 = memref.load %arg2[%0] : memref<4xi32, #tpu.memory_space<smem>>
    %c0_i32 = arith.constant 0 : i32
    %c0_i32_0 = arith.constant 0 : i32
    return %1, %c0_i32, %arg1 : i32, i32, i32
  }
  func.func @transform_4(%arg0: i32, %arg1: i32, %arg2: memref<4xi32, #tpu.memory_space<smem>>, %arg3: memref<4xi32, #tpu.memory_space<smem>>) -> (i32, i32, i32) {
    %0 = arith.index_cast %arg0 : i32 to index
    %1 = memref.load %arg2[%0] : memref<4xi32, #tpu.memory_space<smem>>
    %c0_i32 = arith.constant 0 : i32
    %c0_i32_0 = arith.constant 0 : i32
    return %1, %arg1, %c0_i32 : i32, i32, i32
  }
  func.func @transform_5(%arg0: i32, %arg1: i32, %arg2: memref<4xi32, #tpu.memory_space<smem>>, %arg3: memref<4xi32, #tpu.memory_space<smem>>) -> (i32, i32, i32) {
    %0 = arith.index_cast %arg0 : i32 to index
    %1 = memref.load %arg2[%0] : memref<4xi32, #tpu.memory_space<smem>>
    %c0_i32 = arith.constant 0 : i32
    %c0_i32_0 = arith.constant 0 : i32
    %c0_i32_1 = arith.constant 0 : i32
    return %1, %c0_i32, %c0_i32_0 : i32, i32, i32
  }
  func.func @transform_6(%arg0: i32, %arg1: i32, %arg2: memref<4xi32, #tpu.memory_space<smem>>, %arg3: memref<4xi32, #tpu.memory_space<smem>>) -> (i32, i32) {
    %c0_i32 = arith.constant 0 : i32
    %c0_i32_0 = arith.constant 0 : i32
    return %arg0, %c0_i32 : i32, i32
  }
}

</mosaic_0001>

<bundles_post_ra>
// kernel: custom-call.1
= control target key start
LH: loop header
LB: loop body
LE: loop exit
PB: predicated region body
PF: predicated region fallthrough
CT: control target
= control target key end

     0   :  { %s6_s0 = inlined_call_operand.vmem [shape: u32[4], index: 0, kind: output, shape index: {}]  }

// kernel: moe_forward.1
= control target key start
LH: loop header
LB: loop body
LE: loop exit
PB: predicated region body
PF: predicated region fallthrough
CT: control target
= control target key end

     0   :  { %s1230_s0 = inlined_call_operand.vmem [shape: s32[4], index: 0, kind: input, shape index: {}]   ;;  %s1231_s2 = inlined_call_operand.vmem [shape: bf16[64,128], index: 2, kind: input, shape index: {}]   ;;  %s1232_s3 = inlined_call_operand.vmem [shape: f32[64,1], index: 3, kind: input, shape index: {}]   ;;  %s1233_s4 = inlined_call_operand.vmem [shape: bf16[4,128,128], index: 4, kind: input, shape index: {}]   ;;  %s1234_s5 = inlined_call_operand.vmem [shape: f32[4,1,128], index: 5, kind: input, shape index: {}]   ;;  %s1235_s6 = inlined_call_operand.vmem [shape: bf16[4,128,128], index: 6, kind: input, shape index: {}]   ;;  %s1236_s7 = inlined_call_operand.vmem [shape: f32[4,1,128], index: 7, kind: input, shape index: {}]   ;;  %s1237_s8 = inlined_call_operand.vmem [shape: f32[64,128], index: 8, kind: output, shape index: {}]   ;;  %s1238_s1 = inlined_call_operand.vmem [shape: s32[4], index: 1, kind: input, shape index: {}]  }
   0x1   :  { %s13_s29 = sshll.u32 %s1230_s0, 4  ;;  %s17_s10 = sshll.u32 %s1238_s1, 4  ;;  %s14_s29 = int_to_ptr.vmem [resolvable:$true] %s13_s29  ;;  %s18_s10 = int_to_ptr.vmem [resolvable:$true] %s17_s10 }
   0x2   :  { %s1023_s11 = scalar_lea.vmem %s14_s29, 16  ;;  %p1028_p1 = scmp.lt.s32.totalorder %s14_s29, %s14_s29 }
   0x3   :  { %p1024_p0 = scmp.ne.s32.totalorder %s14_s29, %s1023_s11  ;;  %p1029_p2 = scmp.lt.s32.totalorder %s1023_s11, %s1023_s11 }
   0x5   :  { %p1030_p3 = por %p1029_p2, %p1028_p1 }
   0x7   :  { %p1031_p4 = pnand %p1030_p3, %p1024_p0 }
   0x9   :  { %1034 = shalt.err (!%p1031_p4)  }
   0xa   :  { %s1073_s12 = smov [#allocation3]   ;;  %s1035_s13 = scalar_lea.vmem %s18_s10, 16 }
   0xb   :  { %16 = dma.vmem_to_smem %s14_s29, 16, %s1073_s12, [#allocation2] }
   0xc   :  { %p1036_p5 = scmp.ne.s32.totalorder %s18_s10, %s1035_s13  ;;  %p1040_p6 = scmp.lt.s32.totalorder %s18_s10, %s18_s10 }
   0xd   :  { %p1041_p7 = scmp.lt.s32.totalorder %s1035_s13, %s1035_s13 }
   0xf   :  { %p1042_p8 = por %p1041_p7, %p1040_p6 }
  0x11   :  { %p1043_p9 = pnand %p1042_p8, %p1036_p5 }
  0x13   :  { %1046 = shalt.err (!%p1043_p9)  }
  0x14   :  { %s1074_s0 = smov [#allocation4]  }
  0x15   :  { %20 = dma.vmem_to_smem %s18_s10, 16, %s1074_s0, [#allocation2] }
  0x16   :  { %1059 = dma.done.wait [#allocation2], 32 }
  0x17   :  { %1060 = vsyncadd [#allocation2], 4294967264 }
  0x18   :  { %22 = sfence }
  0x19   :  { %s1130_s1 = smov 0   ;;  %s1132_s14 = smov 0  }
  0x1a   :  { %s1134_s15 = smov 0  }
  0x1b LB: > { %s40_s16 = sadd.s32 1, %s1067_s14  ;;  %p876_p10 = scmp.ge.s32.totalorder %s1071_s15, 1  ;;  %s1071_s15 = sphi %s1134_s15, %s28_s15   ;;  %s1067_s14 = sphi %s1132_s14, %s1240_s14   ;;  %s1063_s1 = sphi %s1130_s1, %s1239_s1  }
  0x1c   : > { %p42_p11 = scmp.ge.s32.totalorder %s40_s16, 4  ;;  %p317_p12 = scmp.lt.s32.totalorder %s1071_s15, 5 }
  0x1e   : > { %s1242_s16 = smov (%p42_p11, %s40_s16), 0  ;;  %p318_p13 = pnand %p876_p10, %p317_p12 }
  0x1f   : > { %s877_s17 = sshll.u32 (!%p318_p13), %s1063_s1, 1  ;;  %s394_s18 = sld [smem:[#allocation3 + %s1063_s1]] (!%p318_p13) }
  0x20   : > { %321 = sbr.rel (%p318_p13) target bundleno = 559 (0x22f), region = 44  ;;  %p383_p0 = scmp.lt.s32.totalorder (!%p318_p13), %s877_s17, 7 }
  0x21   : > { %s404_s19 = sld [smem:[#allocation3 + %s1063_s1]] (!%p318_p13) }
  0x22   : > { %s412_s20 = sld [smem:[#allocation3 + %s1063_s1]] (!%p318_p13) }
  0x23   : > { %s424_s21 = sld [smem:[#allocation3 + %s1063_s1]] (!%p318_p13) }
  0x24   : > { %s436_s22 = sld [smem:[#allocation4 + %s1063_s1]] (!%p318_p13) }
  0x25   : > { %p395_p1 = scmp.lt.s32.totalorder (!%p318_p13), %s394_s18, 3 }
  0x27   : > { %s1244_s17 = smov (!%p383_p0, %s877_s17), 7  ;;  %p405_p2 = scmp.lt.s32.totalorder %s404_s19, 3 }
  0x28   : > { %s878_s23 = sshll.u32 %s1244_s17, 2  ;;  %s880_s24 = sshll.u32 %s1244_s17, 3 }
  0x29   : > { %s1151_s27 = scalar_lea.vmem %s1231_s2, %s878_s23  ;;  %s1156_s30 = scalar_lea.vmem %s1232_s3, %s880_s24 }
  0x2a   : > { %p414_p3 = scmp.lt.s32.totalorder %s412_s20, 3  ;;  %p425_p4 = scmp.lt.s32.totalorder %s424_s21, 3 }
  0x2b   : > { %s1246_s18 = smov (!%p395_p1, %s394_s18), 3  ;;  %s1248_s19 = smov (!%p405_p2, %s404_s19), 3 }
  0x2c   : > { %s910_s9 = sshll.u32 %s1246_s18, 6  ;;  %s1163_s12 = scalar_lea.vmem %s1237_s8, %s880_s24 }
  0x2d   : > { %s1168_s1 = scalar_lea.vmem %s1233_s4, %s910_s9  ;;  %s410_s25 = scalar_lea.vmem %s1234_s5, %s1248_s19 }
  0x2e   : > { %s1250_s20 = smov (!%p414_p3, %s412_s20), 3  ;;  %s1252_s21 = smov (!%p425_p4, %s424_s21), 3 }
  0x2f   : > { %s911_s26 = sshll.u32 %s1250_s20, 6  ;;  %p439_p5 = scmp.eq.s32.totalorder %s436_s22, 0 }
  0x30   : > { %s1179_s24 = scalar_lea.vmem %s1235_s6, %s911_s26  ;;  %s427_s9 = scalar_lea.vmem %s1236_s7, %s1252_s21  ;;  %v1075_v0 = vmov (%p439_p5), 0.0  }
  0x31   : > { %443 = sbr.rel (!%p439_p5) target bundleno = 56 (0x38), region = 48  ;;  %444 = vst [vmem:[%s1163_s12] sm:$0xff] (%p439_p5), %v1075_v0  ;;  %445 = vst [vmem:[%s1163_s12 + $0x8] sm:$0xff] (%p439_p5), %v1075_v0 }
  0x38 PF: > { %448 = sbr.rel (%p439_p5) target bundleno = 559 (0x22f), region = 52  ;;  %v1002_v1 = vld [vmem:[%s1168_s1] sm:$0xff] (!%p439_p5)   ;;  %v1076_v2 = vmov (!%p439_p5), 0.0   ;;  %v1003_v3 = vld [vmem:[%s1168_s1 + $0x8] sm:$0xff] (!%p439_p5)   ;;  %vm1077_vm0 = vmmov (!%p439_p5), 0   ;;  %v1004_v4 = vld [vmem:[%s1168_s1 + $0x10] sm:$0xff] (!%p439_p5)  }
  0x39   : > { %931 = vmatprep.subr.bf16.mxu0 (!%p439_p5), %v1076_v2  ;;  %951 = vmatprep.subr.bf16.mxu1 (!%p439_p5), %v1076_v2  ;;  %v1005_v5 = vld [vmem:[%s1168_s1 + $0x18] sm:$0xff] (!%p439_p5)   ;;  %v1006_v6 = vld [vmem:[%s1168_s1 + $0x20] sm:$0xff] (!%p439_p5)   ;;  %v1007_v7 = vld [vmem:[%s1168_s1 + $0x28] sm:$0xff] (!%p439_p5)   ;;  %v1078_v20 = vmov (!%p439_p5), 0  }
  0x3a   : > { %932 = vmatpush3.bf16.msra.mxu0 (!%p439_p5), %v1002_v1  ;;  %947 = vmatprep.mubr.msk.bf16.mxu0 (!%p439_p5), %vm1077_vm0, %v1076_v2  ;;  %v1008_v8 = vld [vmem:[%s1168_s1 + $0x30] sm:$0xff] (!%p439_p5)   ;;  %v1009_v9 = vld [vmem:[%s1168_s1 + $0x38] sm:$0xff] (!%p439_p5)   ;;  %v1010_v10 = vld [vmem:[%s1151_s27] sm:$0xff] (!%p439_p5)  }
  0x3b   : > { %933 = vmatprep.subr.bf16.mxu0 (!%p439_p5), %v1076_v2  ;;  %967 = vmatprep.mubr.msk.bf16.mxu1 (!%p439_p5), %vm1077_vm0, %v1076_v2  ;;  %v1011_v11 = vld [vmem:[%s1179_s24] sm:$0xff] (!%p439_p5)   ;;  %v1012_v12 = vld [vmem:[%s1179_s24 + $0x8] sm:$0xff] (!%p439_p5)   ;;  %v1013_v13 = vld [vmem:[%s1179_s24 + $0x10] sm:$0xff] (!%p439_p5)  }
  0x3c   : > { %952 = vmatpush3.bf16.msra.mxu1 (!%p439_p5), %v1011_v11  ;;  %v1014_v14 = vld [vmem:[%s1179_s24 + $0x18] sm:$0xff] (!%p439_p5)   ;;  %v1015_v15 = vld [vmem:[%s1179_s24 + $0x20] sm:$0xff] (!%p439_p5)   ;;  %v1016_v16 = vld [vmem:[%s1179_s24 + $0x28] sm:$0xff] (!%p439_p5)   ;;  %1001 = vset.pattern.permute.xlu0 (!%p439_p5), %v1078_v20 }
  0x3d   : > { %953 = vmatprep.subr.bf16.mxu1 (!%p439_p5), %v1076_v2  ;;  %v1017_v17 = vld [vmem:[%s1179_s24 + $0x30] sm:$0xff] (!%p439_p5)   ;;  %v1018_v18 = vld [vmem:[%s1179_s24 + $0x38] sm:$0xff] (!%p439_p5)   ;;  %v711_v19 = vld [vmem:[%s1156_s30] sm:$0xff] (!%p439_p5) }
  0x3e   : > { %934 = vmatpush3.bf16.msra.mxu0 (!%p439_p5), %v1003_v3  ;;  %726 = vperm.xlu0 (!%p439_p5), %1001, %v711_v19   ;;  %v712_v21 = vld [vmem:[%s1156_s30 + $0x8] sm:$0xff] (!%p439_p5)  ;;  %v889_v22 = vld [vmem:[%s410_s25] ss:$0 sm:$0xff] (!%p439_p5) }
  0x3f   : > { %935 = vmatprep.subr.bf16.mxu0 %v1076_v2  ;;  %v907_v53 = vld [vmem:[%s427_s9] ss:$0 sm:$0xff] }
  0x40   : > { %954 = vmatpush3.bf16.msra.mxu1 %v1012_v12 }
  0x41   : > { %955 = vmatprep.subr.bf16.mxu1 %v1076_v2 }
  0x42   : > { %936 = vmatpush3.bf16.msra.mxu0 %v1004_v4  ;;  %731 = vperm.xlu0 %1001, %v712_v21  }
  0x43   : > { %937 = vmatprep.subr.bf16.mxu0 %v1076_v2 }
  0x44   : > { %956 = vmatpush3.bf16.msra.mxu1 %v1013_v13 }
  0x45   : > { %957 = vmatprep.subr.bf16.mxu1 %v1076_v2 }
  0x46   : > { %938 = vmatpush3.bf16.msra.mxu0 %v1005_v5 }
  0x47   : > { %939 = vmatprep.subr.bf16.mxu0 %v1076_v2 }
  0x48   : > { %958 = vmatpush3.bf16.msra.mxu1 %v1014_v14 }
  0x49   : > { %959 = vmatprep.subr.bf16.mxu1 %v1076_v2 }
  0x4a   : > { %940 = vmatpush3.bf16.msra.mxu0 %v1006_v6 }
  0x4b   : > { %941 = vmatprep.subr.bf16.mxu0 %v1076_v2 }
  0x4c   : > { %960 = vmatpush3.bf16.msra.mxu1 %v1015_v15 }
  0x4d   : > { %961 = vmatprep.subr.bf16.mxu1 %v1076_v2 }
  0x4e   : > { %942 = vmatpush3.bf16.msra.mxu0 %v1007_v7 }
  0x4f   : > { %943 = vmatprep.subr.bf16.mxu0 %v1076_v2 }
  0x50   : > { %962 = vmatpush3.bf16.msra.mxu1 %v1016_v16 }
  0x51   : > { %963 = vmatprep.subr.bf16.mxu1 %v1076_v2 }
  0x52   : > { %944 = vmatpush3.bf16.msra.mxu0 %v1008_v8 }
  0x53   : > { %945 = vmatprep.subr.bf16.mxu0 %v1076_v2 }
  0x54   : > { %964 = vmatpush3.bf16.msra.mxu1 %v1017_v17 }
  0x55   : > { %965 = vmatprep.subr.bf16.mxu1 %v1076_v2 }
  0x56   : > { %946 = vmatpush3.bf16.msra.mxu0 %v1009_v9 }
  0x58   : > { %966 = vmatpush3.bf16.msra.mxu1 %v1018_v18 }
  0x59   : > { %948 = vmatmul.mubr.bf16.vlgmr.msra.gmra.mrb[0].mxu0 %v1010_v10 }
  0xbd   : > { %v727_v52 = vpop.permute.xlu0 %726 }
  0xc1   : > { %v732_v57 = vpop.permute.xlu0 %731 }
 0x12c   : > { %v562_v23 = vpop.f32.mrb[0].mxu0 }
 0x12d   : > { %v563_v24 = vadd.f32 %v889_v22, %v562_v23  ;;  %v949_v25 = vpop.f32.mrb[1].mxu0 }
 0x12e   : > { %v565_v26 = vpop.f32.mrb[2].mxu0 }
 0x12f   : > { %v569_v27 = vmul.f32 %v563_v24, %v563_v24  ;;  %v566_v28 = vadd.f32 %v889_v22, %v565_v26  ;;  %v950_v29 = vpop.f32.mrb[3].mxu0 }
 0x131   : > { %v571_v30 = vmul.f32 %v569_v27, %v563_v24  ;;  %v570_v31 = vmul.f32 %v566_v28, %v566_v28 }
 0x133   : > { %v573_v32 = vmul.f32 0.044715, %v571_v30  ;;  %v572_v33 = vmul.f32 %v570_v31, %v566_v28 }
 0x135   : > { %v575_v34 = vadd.f32 %v573_v32, %v563_v24  ;;  %v574_v35 = vmul.f32 0.044715, %v572_v33 }
 0x137   : > { %v577_v36 = vmul.f32 0.7978846, %v575_v34  ;;  %v576_v37 = vadd.f32 %v574_v35, %v566_v28 }
 0x139   : > { %1019 = vtanh.f32 %v577_v36  ;;  %v578_v38 = vmul.f32 0.7978846, %v576_v37 }
 0x13b   : > { %1021 = vtanh.f32 %v578_v38 }
 0x143   : > { %v1020_v39 = vpop.eup %1019 }
 0x144   : > { %v581_v40 = vadd.f32 1.0, %v1020_v39 }
 0x145   : > { %v1022_v41 = vpop.eup %1021 }
 0x146   : > { %v582_v42 = vadd.f32 1.0, %v1022_v41  ;;  %v583_v43 = vmul.f32 0.5, %v581_v40 }
 0x148   : > { %v584_v44 = vmul.f32 0.5, %v582_v42  ;;  %v585_v45 = vmul.f32 %v583_v43, %v563_v24 }
 0x14a   : > { %v586_v46 = vmul.f32 %v584_v44, %v566_v28 }
 0x14c   : > { %v587_v47 = vpack.c.bf16 %v586_v46, %v585_v45 }
 0x14e   : > { %968 = vmatmul.mubr.bf16.vlgmr.msra.gmra.mrb[0].mxu1 %v587_v47 }
 0x221   : > { %v686_v48 = vpop.f32.mrb[0].mxu1 }
 0x222   : > { %696 = vst [vmem:[%s1163_s12] sm:$0xff] %v686_v48  ;;  %v969_v49 = vpop.f32.mrb[1].mxu1 }
 0x223   : > { %v689_v50 = vpop.f32.mrb[2].mxu1 }
 0x224   : > { %697 = vst [vmem:[%s1163_s12 + $0x8] sm:$0xff] %v689_v50  ;;  %v970_v51 = vpop.f32.mrb[3].mxu1  ;;  %v723_v55 = vadd.f32 %v907_v53, %v689_v50 }
 0x226   : > { %v735_v59 = vmul.f32 %v732_v57, %v723_v55 }
 0x228   : > { %737 = vst [vmem:[%s1163_s12 + $0x8] sm:$0xff] %v735_v59 }
 0x229   : > { %v713_v54 = vld [vmem:[%s1163_s12] sm:$0xff] }
 0x22a   : > { %v722_v56 = vadd.f32 %v907_v53, %v713_v54 }
 0x22c   : > { %v734_v58 = vmul.f32 %v727_v52, %v722_v56 }
 0x22e   : > { %736 = vst [vmem:[%s1163_s12] sm:$0xff] %v734_v58 }
 0x22f PF: > { %s28_s15 = sadd.s32 1, %s1071_s15   ;;  %s1239_s1 = smov %s1067_s14 }
 0x230   : > { %p25_p6 = scmp.ge.s32.totalorder %s28_s15, 6   ;;  %s1240_s14 = smov %s1242_s16 }
 0x232   :  { %27 = sbr.rel (!%p25_p6) target bundleno = 27 (0x1b), region = 109 }

</bundles_post_ra>
